<compile_context>
chip_gen: v5e
topology: v5e:2x2
jax: 0.10.0
libtpu: 0.0.40
codegen_flags: <defaults>
</compile_context>

<pallas_src>
import jax
import jax.numpy as jnp
from jax import lax
from jax.experimental import pallas as pl
from jax.experimental.pallas import tpu as pltpu


def _ortho_loss_kernel(x_ref, o_ref):
    """One grid step = TB batch elements.

    x_ref : (TB, N, C) VMEM tile of the features
    o_ref : (TB, 1)    per-batch Frobenius-norm losses for this tile
    """
    x = x_ref[...]                               # (TB, N, C), input dtype
    xf = x.astype(jnp.float32)
    tb, n, c = xf.shape

    # L2 normalize along channel dim.  F.normalize: x / max(||x||, 1e-12)
    # == x * rsqrt(max(sum(x*x), 1e-24)).  rsqrt goes to the EUP slot.
    sumsq = jnp.sum(xf * xf, axis=2, keepdims=True)          # (TB, N, 1)
    inv = lax.rsqrt(jnp.maximum(sumsq, jnp.float32(1e-24)))  # (TB, N, 1)
    xn_f32 = xf * inv                                        # (TB, N, C)

    # Feed the MXU in the input dtype (bf16 stays bf16); accumulate in f32.
    xn_mxu = xn_f32 if x.dtype == jnp.float32 else xn_f32.astype(x.dtype)

    # Batched Gram matrix  G_b = xn_b @ xn_b^T  without an explicit transpose:
    # contract channel axis (2) of both operands, batch over axis 0.
    gram = lax.dot_general(
        xn_mxu, xn_mxu,
        dimension_numbers=(((2,), (2,)), ((0,), (0,))),
        preferred_element_type=jnp.float32)                  # (TB, N, N)

    # ||G - I||_F^2 = sum(G*G) - 2*trace(G) + N, and trace(G) = sum(xn*xn)
    # (exact, including eps-clamped all-zero rows).
    sq = jnp.sum(jnp.sum(gram * gram, axis=2), axis=1, keepdims=True)    # (TB, 1)
    tr = jnp.sum(jnp.sum(xn_f32 * xn_f32, axis=2), axis=1, keepdims=True)  # (TB, 1)
    fro2 = jnp.maximum(sq - 2.0 * tr + jnp.float32(n), 0.0)  # guard rounding
    o_ref[...] = jnp.sqrt(fro2)


def _pick_batch_tile(B, N, C, itemsize):
    """Largest divisor of B whose per-step working set stays comfortably in
    the default scoped VMEM limit (conservative for v7x's 64 MiB physical)."""
    budget = 12 * 1024 * 1024  # bytes
    def step_bytes(tb):
        # double-buffered input + f32 xn + f32 gram (+ small temps)
        return tb * (2 * N * C * itemsize + 4 * N * C + 4 * N * N)
    tb = B
    while tb > 1 and step_bytes(tb) > budget:
        tb -= 1
        while B % tb != 0:
            tb -= 1
    return tb


def orthogonal_loss(features):
    """features: [B, N, C] float array -> scalar mean orthogonal loss."""
    B, N, C = features.shape
    TB = _pick_batch_tile(B, N, C, features.dtype.itemsize)

    per_batch = pl.pallas_call(
        _ortho_loss_kernel,
        out_shape=jax.ShapeDtypeStruct((B, 1), jnp.float32),
        grid_spec=pltpu.PrefetchScalarGridSpec(
            num_scalar_prefetch=0,
            grid=(B // TB,),
            in_specs=[pl.BlockSpec((TB, N, C), lambda b: (b, 0, 0))],
            out_specs=pl.BlockSpec((TB, 1), lambda b: (b, 0)),
        ),
        compiler_params=pltpu.CompilerParams(
            dimension_semantics=("parallel",)),  # independent per-batch tiles
    )(features)
    return jnp.mean(per_batch)


def _reference(features):
    # Pure-JAX reference mirroring the PyTorch module.
    f32 = features.astype(jnp.float32)
    norm = jnp.sqrt(jnp.sum(f32 * f32, axis=2, keepdims=True))
    f = f32 / jnp.maximum(norm, 1e-12)
    gram = jnp.einsum("bnc,bmc->bnm", f, f)
    eye = jnp.eye(features.shape[1], dtype=jnp.float32)
    per_b = jnp.sqrt(jnp.sum((gram - eye) ** 2, axis=(1, 2)))
    return jnp.mean(per_b)


if __name__ == "__main__":
    key = jax.random.PRNGKey(0)
    B, N, C = 2, 8, 32
    features = jax.random.normal(key, (B, N, C), dtype=jnp.float32)

    loss = orthogonal_loss(features)
    loss = jax.block_until_ready(loss)

    ref = _reference(features)
    assert jnp.allclose(loss, ref, atol=1e-4, rtol=1e-4), (loss, ref)

    print("KERNEL_OK")
</pallas_src>

<mosaic_0001>
module attributes {stable_mosaic.version = 11 : i64} {
  func.func @_ortho_loss_kernel(%arg0: i32, %arg1: memref<2x8x32xf32, #tpu.memory_space<vmem>>, %arg2: memref<2x1xf32, #tpu.memory_space<vmem>>) attributes {dimension_semantics = [#tpu.dimension_semantics<parallel>], iteration_bounds = array<i64: 1>, scalar_prefetch = 0 : i64, scratch_operands = 0 : i64, tpu.core_type = #tpu.core_type<tc>, window_params = [{transform_indices = @transform_0, window_bounds = array<i64: 2, 8, 32>}, {transform_indices = @transform_1, window_bounds = array<i64: 2, 1>}]} {
    %c0 = arith.constant 0 : index
    %c0_0 = arith.constant 0 : index
    %c0_1 = arith.constant 0 : index
    %0 = vector.load %arg1[%c0, %c0_0, %c0_1] : memref<2x8x32xf32, #tpu.memory_space<vmem>>, vector<2x8x32xf32>
    %1 = arith.mulf %0, %0 : vector<2x8x32xf32>
    %cst = arith.constant dense<0.000000e+00> : vector<2x8xf32>
    %2 = vector.multi_reduction <add>, %1, %cst [2] : vector<2x8x32xf32> to vector<2x8xf32>
    %3 = vector.shape_cast %2 : vector<2x8xf32> to vector<2x8x1xf32>
    %cst_2 = arith.constant 1.000000e-24 : f32
    %4 = vector.broadcast %cst_2 : f32 to vector<2x8x1xf32>
    %5 = arith.maximumf %3, %4 : vector<2x8x1xf32>
    %6 = math.rsqrt %5 : vector<2x8x1xf32>
    %7 = vector.broadcast %6 : vector<2x8x1xf32> to vector<2x8x32xf32>
    %8 = arith.mulf %0, %7 : vector<2x8x32xf32>
    %cst_3 = arith.constant dense<0.000000e+00> : vector<2x8x8xf32>
    %9 = tpu.matmul %8, %8, %cst_3 {dimension_numbers = #tpu.dot_dimension_numbers<[2], [2], [1], [1], [0, 0, 0, 1, 1, 1], [0], [0]>} : vector<2x8x32xf32>, vector<2x8x32xf32>, vector<2x8x8xf32> -> vector<2x8x8xf32>
    %10 = arith.mulf %9, %9 : vector<2x8x8xf32>
    %cst_4 = arith.constant dense<0.000000e+00> : vector<2x8xf32>
    %11 = vector.multi_reduction <add>, %10, %cst_4 [2] : vector<2x8x8xf32> to vector<2x8xf32>
    %cst_5 = arith.constant dense<0.000000e+00> : vector<2xf32>
    %12 = vector.multi_reduction <add>, %11, %cst_5 [1] : vector<2x8xf32> to vector<2xf32>
    %13 = vector.shape_cast %12 : vector<2xf32> to vector<2x1xf32>
    %14 = arith.mulf %8, %8 : vector<2x8x32xf32>
    %cst_6 = arith.constant dense<0.000000e+00> : vector<2x8xf32>
    %15 = vector.multi_reduction <add>, %14, %cst_6 [2] : vector<2x8x32xf32> to vector<2x8xf32>
    %cst_7 = arith.constant dense<0.000000e+00> : vector<2xf32>
    %16 = vector.multi_reduction <add>, %15, %cst_7 [1] : vector<2x8xf32> to vector<2xf32>
    %17 = vector.shape_cast %16 : vector<2xf32> to vector<2x1xf32>
    %cst_8 = arith.constant 2.000000e+00 : f32
    %18 = vector.broadcast %cst_8 : f32 to vector<2x1xf32>
    %19 = arith.mulf %18, %17 : vector<2x1xf32>
    %20 = arith.subf %13, %19 : vector<2x1xf32>
    %cst_9 = arith.constant 8.000000e+00 : f32
    %21 = vector.broadcast %cst_9 : f32 to vector<2x1xf32>
    %22 = arith.addf %20, %21 : vector<2x1xf32>
    %cst_10 = arith.constant 0.000000e+00 : f32
    %23 = vector.broadcast %cst_10 : f32 to vector<2x1xf32>
    %24 = arith.maximumf %22, %23 : vector<2x1xf32>
    %25 = math.sqrt %24 : vector<2x1xf32>
    %c0_11 = arith.constant 0 : index
    %c0_12 = arith.constant 0 : index
    %26 = vector.load %arg2[%c0_11, %c0_12] : memref<2x1xf32, #tpu.memory_space<vmem>>, vector<2x1xf32>
    tpu.vector_store %arg2[%c0_11, %c0_12], %25 {strides = array<i32>} : memref<2x1xf32, #tpu.memory_space<vmem>>, vector<2x1xf32>,
    return
  }
  func.func @transform_0(%arg0: i32) -> (i32, i32, i32) {
    %c0_i32 = arith.constant 0 : i32
    %c0_i32_0 = arith.constant 0 : i32
    %c0_i32_1 = arith.constant 0 : i32
    return %arg0, %c0_i32, %c0_i32_0 : i32, i32, i32
  }
  func.func @transform_1(%arg0: i32) -> (i32, i32) {
    %c0_i32 = arith.constant 0 : i32
    %c0_i32_0 = arith.constant 0 : i32
    return %arg0, %c0_i32 : i32, i32
  }
}

</mosaic_0001>

<bundles_post_ra>
// kernel: tpu_custom_call.1
= control target key start
LH: loop header
LB: loop body
LE: loop exit
PB: predicated region body
PF: predicated region fallthrough
CT: control target
= control target key end

     0   :  { %6 = vsyncpa [#allocation3], 0  ;;  %s206_s9 = smov [#allocation2]   ;;  %s207_s11 = smov 128   ;;  %s237_s0 = inlined_call_operand.hbm [shape: f32[2,8,32], index: 0, kind: input, shape index: {}]   ;;  %s238_s1 = inlined_call_operand.vmem [shape: f32[2,1], index: 1, kind: output, shape index: {}]  }
   0x1   :  { %s11_s8 = sshll.u32 %s237_s0, 4  ;;  %s13_s10 = sshll.u32 %s206_s9, 4  ;;  %s12_s8 = int_to_ptr.hbm [resolvable:$true] %s11_s8  ;;  %s14_s10 = int_to_ptr.vmem [resolvable:$true] %s13_s10 }
   0x2   :  { %s208_s12 = smov 8  }
   0x3   :  { %19 = dma.hbm_to_vmem [thread:$0]  %s12_s8, 256, %s14_s10, [#allocation3], %s207_s11, %s207_s11, %s208_s12  }
   0x4   :  { %204 = dma.done.wait [#allocation3], 256  }
   0x5   :  { %205 = vsyncadd [#allocation3], 4294967040  ;;  %v24_v0 = vld [vmem:[#allocation2] sm:$0xff]  ;;  %vm28_vm0 = vcmask 261120   ;;  %v25_v2 = vld [vmem:[#allocation2 + $0x8] sm:$0xff]  ;;  %v116_v31 = vlaneseq  ;;  %vm120_vm7 = vcmask 1041409  }
   0x6   :  { %v26_v1 = vmul.f32 %v24_v0, %v24_v0  ;;  %v27_v4 = vmul.f32 %v25_v2, %v25_v2  ;;  %vm123_vm8 = vcmask 58368   ;;  %vm107_vm9 = vcmask 64512  }
   0x7   :  { %v117_v32 = vand.u32 127, %v116_v31  ;;  %vm160_vm10 = vcmask 1024  }
   0x8   :  { %v29_v3 = vsel %vm28_vm0, %v26_v1, 0.0  ;;  %v32_v5 = vsel %vm28_vm0, %v27_v4, 0.0 }
   0x9   :  { %30 = vadd.xlane.f32.xlu0 %v29_v3 }
  0x11   :  { %33 = vadd.xlane.f32.xlu0 %v32_v5 }
  0x7c   :  { %v31_v6 = vpop.xlane.xlu0 %30 }
  0x7d   :  { %v35_v7 = vmax.f32 %v31_v6, 1e-24 }
  0x7f   :  { %174 = vrsqrt.f32 %v35_v7  ;;  %vm43_vm2 = vweird.f32 %v35_v7 }
  0x84   :  { %v34_v8 = vpop.xlane.xlu0 %33 }
  0x85   :  { %v175_v9 = vpop.eup %174  ;;  %v36_v10 = vmax.f32 %v34_v8, 1e-24 }
  0x86   :  { %v38_v11 = vmul.f32 %v175_v9, %v35_v7  ;;  %vm44_vm1 = vweird.f32 %v175_v9 }
  0x87   :  { %176 = vrsqrt.f32 %v36_v10  ;;  %vm45_vm3 = vmor %vm43_vm2, %vm44_vm1  ;;  %vm53_vm5 = vweird.f32 %v36_v10 }
  0x88   :  { %v39_v12 = vmul.f32 %v175_v9, %v38_v11 }
  0x8a   :  { %v40_v13 = vmul.f32 0.5, %v39_v12 }
  0x8c   :  { %v41_v14 = vsub.f32 1.5, %v40_v13 }
  0x8d   :  { %v177_v15 = vpop.eup %176 }
  0x8e   :  { %v48_v16 = vmul.f32 %v177_v15, %v36_v10  ;;  %v42_v17 = vmul.f32 %v175_v9, %v41_v14  ;;  %vm54_vm4 = vweird.f32 %v177_v15 }
  0x8f   :  { %vm55_vm6 = vmor %vm53_vm5, %vm54_vm4 }
  0x90   :  { %v49_v18 = vmul.f32 %v177_v15, %v48_v16  ;;  %v46_v19 = vsel %vm45_vm3, %v175_v9, %v42_v17 }
  0x91   :  { %v57_v20 = vmul.f32 %v46_v19, %v24_v0 }
  0x92   :  { %v50_v21 = vmul.f32 0.5, %v49_v18 }
  0x93   :  { %167 = vmatpush.xpose.msk.msra.mxu0 %vm28_vm0, %v57_v20  ;;  %v127_v22 = vmul.f32 %v57_v20, %v57_v20 }
  0x94   :  { %v51_v23 = vsub.f32 1.5, %v50_v21 }
  0x95   :  { %v129_v24 = vsel %vm28_vm0, %v127_v22, 0.0 }
  0x96   :  { %130 = vadd.xlane.f32.xlu1 %v129_v24  ;;  %168 = vmatmul.msk.f32.vlgmr.msra.gmra.mxu0 %vm28_vm0, %v57_v20  ;;  %v52_v25 = vmul.f32 %v177_v15, %v51_v23 }
  0x98   :  { %v56_v26 = vsel %vm55_vm6, %v177_v15, %v52_v25 }
  0x99   :  { %v58_v27 = vmul.f32 %v56_v26, %v25_v2 }
  0x9b   :  { %169 = vmatpush.xpose.msk.msra.mxu1 %vm28_vm0, %v58_v27  ;;  %v128_v28 = vmul.f32 %v58_v27, %v58_v27 }
  0x9d   :  { %v132_v29 = vsel %vm28_vm0, %v128_v28, 0.0 }
  0x9e   :  { %133 = vadd.xlane.f32.xlu1 %v132_v29  ;;  %170 = vmatmul.msk.f32.vlgmr.msra.gmra.mxu1 %vm28_vm0, %v58_v27 }
 0x109   :  { %v131_v30 = vpop.xlane.xlu1 %130 }
 0x10a   :  { %v137_v34 = vperm.slane %v131_v30, %v117_v32 }
 0x111   :  { %v134_v33 = vpop.xlane.xlu1 %133 }
 0x112   :  { %v138_v35 = vperm.slane %v134_v33, %v117_v32 }
 0x113   :  { %v79_v36 = vpop.f32.mrf.mxu0 }
 0x114   :  { %v105_v37 = vmul.f32 %v79_v36, %v79_v36  ;;  %v139_v38 = vsel %vm120_vm7, %v138_v35, %v137_v34 }
 0x115   :  { %v141_v39 = vsel %vm123_vm8, %v139_v38, 0.0 }
 0x116   :  { %142 = vadd.xlane.f32.xlu0 %v141_v39  ;;  %v108_v40 = vsel %vm107_vm9, %v105_v37, 0.0 }
 0x117   :  { %109 = vadd.xlane.f32.xlu2 %v108_v40 }
 0x11b   :  { %v102_v41 = vpop.f32.mrf.mxu1 }
 0x11c   :  { %v106_v42 = vmul.f32 %v102_v41, %v102_v41 }
 0x11e   :  { %v111_v43 = vsel %vm107_vm9, %v106_v42, 0.0 }
 0x11f   :  { %112 = vadd.xlane.f32.xlu2 %v111_v43 }
 0x189   :  { %v143_v50 = vpop.xlane.xlu0 %142 }
 0x18a   :  { %v110_v44 = vpop.xlane.xlu2 %109  ;;  %v144_v51 = vmul.f32 2.0, %v143_v50 }
 0x18b   :  { %v118_v46 = vperm.slane %v110_v44, %v117_v32 }
 0x192   :  { %v113_v45 = vpop.xlane.xlu2 %112 }
 0x193   :  { %v119_v47 = vperm.slane %v113_v45, %v117_v32 }
 0x195   :  { %v121_v48 = vsel %vm120_vm7, %v119_v47, %v118_v46 }
 0x196   :  { %v124_v49 = vsel %vm123_vm8, %v121_v48, 0.0 }
 0x197   :  { %125 = vadd.xlane.f32.xlu1 %v124_v49 }
 0x20a   :  { %v126_v52 = vpop.xlane.xlu1 %125 }
 0x20b   :  { %v145_v53 = vsub.f32 %v126_v52, %v144_v51 }
 0x20d   :  { %v146_v54 = vadd.f32 8.0, %v145_v53 }
 0x20f   :  { %v147_v55 = vmax.f32 %v146_v54, 0.0 }
 0x211   :  { %178 = vrsqrt.f32 %v147_v55  ;;  %vm155_vm11 = vcmp.eq.f32.partialorder %v147_v55, inf  ;;  %v158_v63 = vand.u32 2147483648, %v147_v55  ;;  %vm157_vm12 = vcmp.eq.f32.partialorder %v147_v55, 0.0 }
 0x217   :  { %v179_v56 = vpop.eup %178 }
 0x218   :  { %v149_v57 = vmul.f32 %v179_v56, %v147_v55 }
 0x21a   :  { %v150_v58 = vmul.f32 %v179_v56, %v149_v57 }
 0x21c   :  { %v151_v59 = vmul.f32 0.5, %v150_v58 }
 0x21e   :  { %v152_v60 = vsub.f32 1.5, %v151_v59 }
 0x220   :  { %v153_v61 = vmul.f32 %v179_v56, %v152_v60 }
 0x222   :  { %v154_v62 = vmul.f32 %v153_v61, %v147_v55 }
 0x224   :  { %v156_v0 = vsel %vm155_vm11, %v147_v55, %v154_v62 }
 0x225   :  { %v159_v1 = vsel %vm157_vm12, %v158_v63, %v156_v0 }
 0x226   :  { %161 = vst.msk [vmem:[%s238_s1] sm:$0x3] %vm160_vm10, %v159_v1 }
 0x227   :  { %166 = vsyncpa [#allocation3], 1 }

</bundles_post_ra>
